<compile_context>
chip_gen: v6e
topology: v6e:2x2x1
jax: 0.10.0
libtpu: 0.0.40
codegen_flags: <defaults>
</compile_context>

<pallas_src>
import jax
import jax.numpy as jnp
from jax.experimental import pallas as pl
from jax.experimental.pallas import tpu as pltpu

IN_DIM = 32
HIDDEN = 32            # == IN_DIM -> hidden layers become residual blocks
OUT_DIM = 4
W0 = 1.0
MAX_TN = 8192          # flattened-batch rows per grid step (multiple of 128)


def _round_up(a: int, b: int) -> int:
    return (a + b - 1) // b * b


def _choose_tile(n: int) -> int:
    """Batch-tile (second-to-last block dim). Must be a multiple of 8."""
    if n <= 256:
        return _round_up(max(n, 1), 8)
    # Prefer >= 2 grid steps (v7x megacore sharding) while keeping tiles big
    # enough to amortize the ~0.35 us per-step pipeline overhead.
    return min(MAX_TN, _round_up(-(-n // 2), 128))


def _mlp_kernel(alphas_ref,            # SMEM (2,) f32 : residual scales
                x_ref,                 # VMEM (TN, IN_DIM) f32, row-major
                w1_ref, w2_ref,        # VMEM (HIDDEN, IN_DIM), (HIDDEN, HIDDEN) bf16
                w3t_ref,               # VMEM (HIDDEN, OUT_DIM) bf16  (= W3^T)
                b3_ref,                # VMEM (1, OUT_DIM) f32
                o_ref):                # VMEM (TN, OUT_DIM) out dtype
    # Hoist scalar reads.
    a0 = alphas_ref[0]
    a1 = alphas_ref[1]

    # Lane-dense activations: put the large batch axis on the 128-lane axis.
    # The transpose runs on the XLU, which is otherwise idle (VPU does sin).
    xt = jnp.transpose(x_ref[...])                      # (IN_DIM, TN) f32
    h = xt                                              # f32 skip path

    # Residual block 1: h = sin(w0 * (W1 @ h)) + a0 * h
    z = jnp.dot(w1_ref[...], xt.astype(jnp.bfloat16),
                preferred_element_type=jnp.float32)
    if W0 != 1.0:                                       # folded when w0 == 1.0
        z = W0 * z
    h = jnp.sin(z) + a0 * h

    # Residual block 2: h = sin(w0 * (W2 @ h)) + a1 * h
    z = jnp.dot(w2_ref[...], h.astype(jnp.bfloat16),
                preferred_element_type=jnp.float32)
    if W0 != 1.0:
        z = W0 * z
    h = jnp.sin(z) + a1 * h

    # Output layer (bias, no activation), produced row-major so it stores
    # straight into the (N, OUT_DIM) result with no wrapper-side transpose.
    h_rm = jnp.transpose(h)                             # (TN, HIDDEN) f32
    o = jnp.dot(h_rm.astype(jnp.bfloat16), w3t_ref[...],
                preferred_element_type=jnp.float32)     # (TN, OUT_DIM)
    o_ref[...] = (o + b3_ref[...]).astype(o_ref.dtype)


@jax.jit
def mlp_forward(x, alphas, w1, w2, w3, b3):
    """x: (..., IN_DIM) -> (..., OUT_DIM). Flattens leading dims like the torch module.

    Weights are in PyTorch nn.Linear layout: w* is (out_features, in_features).
    """
    lead_shape = x.shape[:-1]
    x2d = x.reshape(-1, x.shape[-1])
    n = x2d.shape[0]

    tn = _choose_tile(n)
    grid = (-(-n // tn),)            # ceil; ragged last block is masked by Pallas

    out = pl.pallas_call(
        _mlp_kernel,
        out_shape=jax.ShapeDtypeStruct((n, OUT_DIM), x.dtype),
        grid=grid,
        in_specs=[
            pl.BlockSpec(memory_space=pltpu.SMEM),                 # alphas (2,)
            pl.BlockSpec((tn, IN_DIM), lambda i: (i, 0)),          # x rows (as-is)
            pl.BlockSpec((HIDDEN, IN_DIM), lambda i: (0, 0)),      # W1 (DMA hoisted)
            pl.BlockSpec((HIDDEN, HIDDEN), lambda i: (0, 0)),      # W2
            pl.BlockSpec((HIDDEN, OUT_DIM), lambda i: (0, 0)),     # W3^T
            pl.BlockSpec((1, OUT_DIM), lambda i: (0, 0)),          # b3
        ],
        out_specs=pl.BlockSpec((tn, OUT_DIM), lambda i: (i, 0)),
        compiler_params=pltpu.CompilerParams(
            dimension_semantics=("parallel",),
            vmem_limit_bytes=32 * 1024 * 1024),
    )(alphas,
      x2d,
      w1.astype(jnp.bfloat16),
      w2.astype(jnp.bfloat16),
      w3.T.astype(jnp.bfloat16),
      b3.reshape(1, OUT_DIM).astype(jnp.float32))

    return out.reshape(*lead_shape, OUT_DIM)


def _reference_f32(x, alphas, w1, w2, w3, b3):
    """Pure f32 reference matching the PyTorch module."""
    lead = x.shape[:-1]
    h = x.reshape(-1, x.shape[-1]).astype(jnp.float32)
    h = jnp.sin(W0 * (h @ w1.T)) + alphas[0] * h
    h = jnp.sin(W0 * (h @ w2.T)) + alphas[1] * h
    o = h @ w3.T + b3[None, :]
    return o.reshape(*lead, OUT_DIM)


def _reference_bf16(x, alphas, w1, w2, w3, b3):
    """Mirrors the kernel: f32 skip path, bf16 matmul inputs, f32 accumulation."""
    lead = x.shape[:-1]
    bf = jnp.bfloat16
    h = x.reshape(-1, x.shape[-1]).astype(jnp.float32)
    z = jnp.dot(h.astype(bf), w1.astype(bf).T, preferred_element_type=jnp.float32)
    h = jnp.sin(W0 * z) + alphas[0] * h
    z = jnp.dot(h.astype(bf), w2.astype(bf).T, preferred_element_type=jnp.float32)
    h = jnp.sin(W0 * z) + alphas[1] * h
    o = jnp.dot(h.astype(bf), w3.astype(bf).T,
                preferred_element_type=jnp.float32) + b3[None, :]
    return o.reshape(*lead, OUT_DIM)


def _init_params(key):
    """Deterministic SIREN-style init (synthetic weights, PyTorch (out,in) layout)."""
    k1, k2, k3, k4 = jax.random.split(key, 4)
    # first layer: U(-1/in, 1/in); later layers: U(-sqrt(6/in)/w0, sqrt(6/in)/w0)
    w1 = jax.random.uniform(k1, (HIDDEN, IN_DIM), jnp.float32,
                            -1.0 / IN_DIM, 1.0 / IN_DIM)
    c = float(jnp.sqrt(6.0 / HIDDEN) / W0)
    w2 = jax.random.uniform(k2, (HIDDEN, HIDDEN), jnp.float32, -c, c)
    # output nn.Linear default init: U(-1/sqrt(fan_in), 1/sqrt(fan_in))
    bound = 1.0 / float(jnp.sqrt(HIDDEN))
    w3 = jax.random.uniform(k3, (OUT_DIM, HIDDEN), jnp.float32, -bound, bound)
    b3 = jax.random.uniform(k4, (OUT_DIM,), jnp.float32, -bound, bound)
    alphas = jnp.ones((2,), jnp.float32)   # LinearResidual weight init = 1.0
    return alphas, w1, w2, w3, b3


if __name__ == "__main__":
    key = jax.random.PRNGKey(0)
    kx, kp, kx2 = jax.random.split(key, 3)

    alphas, w1, w2, w3, b3 = _init_params(kp)

    # Small input with extra leading dims: (batch=2, seq=8, in_dim=32).
    x = jax.random.normal(kx, (2, 8, IN_DIM), jnp.float32)
    out = jax.block_until_ready(mlp_forward(x, alphas, w1, w2, w3, b3))
    assert out.shape == (2, 8, OUT_DIM), out.shape

    # Tight check against a reference with the same bf16 matmul-input rounding.
    ref_bf16 = _reference_bf16(x, alphas, w1, w2, w3, b3)
    assert jnp.allclose(out, ref_bf16, atol=2e-3, rtol=2e-3), \
        float(jnp.max(jnp.abs(out - ref_bf16)))

    # Looser check against the pure-f32 module semantics (bf16 quantization error).
    ref_f32 = _reference_f32(x, alphas, w1, w2, w3, b3)
    assert jnp.allclose(out, ref_f32, atol=3e-2, rtol=3e-2), \
        float(jnp.max(jnp.abs(out - ref_f32)))

    # Larger batch exercising the multi-step grid (4096 rows -> 2 steps of 2048).
    xl = jax.random.normal(kx2, (8, 512, IN_DIM), jnp.float32)
    outl = jax.block_until_ready(mlp_forward(xl, alphas, w1, w2, w3, b3))
    assert outl.shape == (8, 512, OUT_DIM), outl.shape
    refl = _reference_bf16(xl, alphas, w1, w2, w3, b3)
    assert jnp.allclose(outl, refl, atol=2e-3, rtol=2e-3), \
        float(jnp.max(jnp.abs(outl - refl)))

    print("KERNEL_OK")
</pallas_src>

<mosaic_0001>
module attributes {stable_mosaic.version = 11 : i64} {
  func.func @_mlp_kernel(%arg0: i32, %arg1: memref<2xf32, #tpu.memory_space<smem>>, %arg2: memref<16x32xf32, #tpu.memory_space<vmem>>, %arg3: memref<32x32xbf16, #tpu.memory_space<vmem>>, %arg4: memref<32x32xbf16, #tpu.memory_space<vmem>>, %arg5: memref<32x4xbf16, #tpu.memory_space<vmem>>, %arg6: memref<1x4xf32, #tpu.memory_space<vmem>>, %arg7: memref<16x4xf32, #tpu.memory_space<vmem>>) attributes {dimension_semantics = [#tpu.dimension_semantics<parallel>], iteration_bounds = array<i64: 1>, scalar_prefetch = 0 : i64, scratch_operands = 0 : i64, tpu.core_type = #tpu.core_type<tc>, window_params = [{transform_indices = @transform_0, window_bounds = array<i64: 2>}, {transform_indices = @transform_1, window_bounds = array<i64: 16, 32>}, {pipeline_mode = #tpu.pipeline_mode<synchronous>, transform_indices = @transform_2, window_bounds = array<i64: 32, 32>}, {pipeline_mode = #tpu.pipeline_mode<synchronous>, transform_indices = @transform_3, window_bounds = array<i64: 32, 32>}, {pipeline_mode = #tpu.pipeline_mode<synchronous>, transform_indices = @transform_4, window_bounds = array<i64: 32, 4>}, {pipeline_mode = #tpu.pipeline_mode<synchronous>, transform_indices = @transform_5, window_bounds = array<i64: 1, 4>}, {transform_indices = @transform_6, window_bounds = array<i64: 16, 4>}]} {
    %c0 = arith.constant 0 : index
    %0 = memref.load %arg1[%c0] : memref<2xf32, #tpu.memory_space<smem>>
    %c1 = arith.constant 1 : index
    %1 = memref.load %arg1[%c1] : memref<2xf32, #tpu.memory_space<smem>>
    %c0_0 = arith.constant 0 : index
    %c0_1 = arith.constant 0 : index
    %2 = vector.load %arg2[%c0_0, %c0_1] : memref<16x32xf32, #tpu.memory_space<vmem>>, vector<16x32xf32>
    %3 = tpu.transpose %2, [1, 0] : vector<16x32xf32> -> vector<32x16xf32>
    %c0_2 = arith.constant 0 : index
    %c0_3 = arith.constant 0 : index
    %4 = vector.load %arg3[%c0_2, %c0_3] : memref<32x32xbf16, #tpu.memory_space<vmem>>, vector<32x32xbf16>
    %5 = arith.truncf %3 : vector<32x16xf32> to vector<32x16xbf16>
    %cst = arith.constant dense<0.000000e+00> : vector<32x16xf32>
    %6 = tpu.matmul %4, %5, %cst {dimension_numbers = #tpu.dot_dimension_numbers<[1], [0], [0], [1], [0, 0, 1, 1], [], []>} : vector<32x32xbf16>, vector<32x16xbf16>, vector<32x16xf32> -> vector<32x16xf32>
    %7 = math.sin %6 : vector<32x16xf32>
    %8 = vector.broadcast %0 : f32 to vector<32x16xf32>
    %9 = arith.mulf %8, %3 : vector<32x16xf32>
    %10 = arith.addf %7, %9 : vector<32x16xf32>
    %c0_4 = arith.constant 0 : index
    %c0_5 = arith.constant 0 : index
    %11 = vector.load %arg4[%c0_4, %c0_5] : memref<32x32xbf16, #tpu.memory_space<vmem>>, vector<32x32xbf16>
    %12 = arith.truncf %10 : vector<32x16xf32> to vector<32x16xbf16>
    %cst_6 = arith.constant dense<0.000000e+00> : vector<32x16xf32>
    %13 = tpu.matmul %11, %12, %cst_6 {dimension_numbers = #tpu.dot_dimension_numbers<[1], [0], [0], [1], [0, 0, 1, 1], [], []>} : vector<32x32xbf16>, vector<32x16xbf16>, vector<32x16xf32> -> vector<32x16xf32>
    %14 = math.sin %13 : vector<32x16xf32>
    %15 = vector.broadcast %1 : f32 to vector<32x16xf32>
    %16 = arith.mulf %15, %10 : vector<32x16xf32>
    %17 = arith.addf %14, %16 : vector<32x16xf32>
    %18 = tpu.transpose %17, [1, 0] : vector<32x16xf32> -> vector<16x32xf32>
    %19 = arith.truncf %18 : vector<16x32xf32> to vector<16x32xbf16>
    %c0_7 = arith.constant 0 : index
    %c0_8 = arith.constant 0 : index
    %20 = vector.load %arg5[%c0_7, %c0_8] : memref<32x4xbf16, #tpu.memory_space<vmem>>, vector<32x4xbf16>
    %cst_9 = arith.constant dense<0.000000e+00> : vector<16x4xf32>
    %21 = tpu.matmul %19, %20, %cst_9 {dimension_numbers = #tpu.dot_dimension_numbers<[1], [0], [0], [1], [0, 0, 1, 1], [], []>} : vector<16x32xbf16>, vector<32x4xbf16>, vector<16x4xf32> -> vector<16x4xf32>
    %c0_10 = arith.constant 0 : index
    %c0_11 = arith.constant 0 : index
    %22 = vector.load %arg6[%c0_10, %c0_11] : memref<1x4xf32, #tpu.memory_space<vmem>>, vector<1x4xf32>
    %23 = vector.broadcast %22 : vector<1x4xf32> to vector<16x4xf32>
    %24 = arith.addf %21, %23 : vector<16x4xf32>
    %c0_12 = arith.constant 0 : index
    %c0_13 = arith.constant 0 : index
    %25 = vector.load %arg7[%c0_12, %c0_13] : memref<16x4xf32, #tpu.memory_space<vmem>>, vector<16x4xf32>
    tpu.vector_store %arg7[%c0_12, %c0_13], %24 {strides = array<i32>} : memref<16x4xf32, #tpu.memory_space<vmem>>, vector<16x4xf32>,
    return
  }
  func.func @transform_0(%arg0: i32) -> i32 {
    %c0_i32 = arith.constant 0 : i32
    %c0_i32_0 = arith.constant 0 : i32
    return %c0_i32 : i32
  }
  func.func @transform_1(%arg0: i32) -> (i32, i32) {
    %c0_i32 = arith.constant 0 : i32
    %c0_i32_0 = arith.constant 0 : i32
    return %arg0, %c0_i32 : i32, i32
  }
  func.func @transform_2(%arg0: i32) -> (i32, i32) {
    %c0_i32 = arith.constant 0 : i32
    %c0_i32_0 = arith.constant 0 : i32
    %c0_i32_1 = arith.constant 0 : i32
    return %c0_i32, %c0_i32_0 : i32, i32
  }
  func.func @transform_3(%arg0: i32) -> (i32, i32) {
    %c0_i32 = arith.constant 0 : i32
    %c0_i32_0 = arith.constant 0 : i32
    %c0_i32_1 = arith.constant 0 : i32
    return %c0_i32, %c0_i32_0 : i32, i32
  }
  func.func @transform_4(%arg0: i32) -> (i32, i32) {
    %c0_i32 = arith.constant 0 : i32
    %c0_i32_0 = arith.constant 0 : i32
    %c0_i32_1 = arith.constant 0 : i32
    return %c0_i32, %c0_i32_0 : i32, i32
  }
  func.func @transform_5(%arg0: i32) -> (i32, i32) {
    %c0_i32 = arith.constant 0 : i32
    %c0_i32_0 = arith.constant 0 : i32
    %c0_i32_1 = arith.constant 0 : i32
    return %c0_i32, %c0_i32_0 : i32, i32
  }
  func.func @transform_6(%arg0: i32) -> (i32, i32) {
    %c0_i32 = arith.constant 0 : i32
    %c0_i32_0 = arith.constant 0 : i32
    return %arg0, %c0_i32 : i32, i32
  }
}

</mosaic_0001>

<bundles_post_ra>
// kernel: mlp_forward.1
= control target key start
LH: loop header
LB: loop body
LE: loop exit
PB: predicated region body
PF: predicated region fallthrough
CT: control target
= control target key end

     0   :  { %11 = vsyncpa [#allocation3], 0  ;;  %s2040_s0 = inlined_call_operand.vmem [shape: f32[2], index: 0, kind: input, shape index: {}]   ;;  %s2041_s1 = inlined_call_operand.vmem [shape: f32[16,32], index: 1, kind: input, shape index: {}]   ;;  %s2042_s2 = inlined_call_operand.vmem [shape: bf16[32,32], index: 2, kind: input, shape index: {}]   ;;  %s2043_s3 = inlined_call_operand.vmem [shape: bf16[32,32], index: 3, kind: input, shape index: {}]   ;;  %s2044_s4 = inlined_call_operand.vmem [shape: bf16[32,4], index: 4, kind: input, shape index: {}]   ;;  %s2045_s5 = inlined_call_operand.vmem [shape: f32[1,4], index: 5, kind: input, shape index: {}]   ;;  %s2046_s6 = inlined_call_operand.vmem [shape: f32[16,4], index: 6, kind: output, shape index: {}]  }
   0x1   :  { %s18_s23 = sshll.u32 %s2040_s0, 4  ;;  %s19_s23 = int_to_ptr.vmem [resolvable:$true] %s18_s23 }
   0x2   :  { %s1333_s24 = scalar_lea.vmem %s19_s23, 16  ;;  %p1338_p1 = scmp.lt.s32.totalorder %s19_s23, %s19_s23 }
   0x3   :  { %p1334_p0 = scmp.ne.s32.totalorder %s19_s23, %s1333_s24  ;;  %p1339_p2 = scmp.lt.s32.totalorder %s1333_s24, %s1333_s24 }
   0x5   :  { %p1340_p3 = por %p1339_p2, %p1338_p1 }
   0x7   :  { %p1341_p4 = pnand %p1340_p3, %p1334_p0 }
   0x9   :  { %1344 = shalt.err (!%p1341_p4)
}
   0xa   :  { %s1347_s25 = smov [#allocation2]  }
   0xb   :  { %21 = dma.vmem_to_smem %s19_s23, 16, %s1347_s25, [#allocation3]  }
   0xc   :  { %1345 = dma.done.wait [#allocation3], 16  }
   0xd   :  { %1346 = vsyncadd [#allocation3], 4294967280 }
   0xe   :  { %35 = sfence }
   0xf   :  { %v39_v0 = vld [vmem:[%s2041_s1] sm:$0xff]  ;;  %v40_v1 = vld [vmem:[%s2041_s1 + $0x8] sm:$0xff]  ;;  %vm89_vm0 = vcmask 261120   ;;  %v1348_v37 = vmov 683565275   ;;  %s37_s9 = sld [smem:[#allocation2]] }
  0x10   :  { %41 = vxpose.xlu0.b32.start [1/2] (short) (narrow) %v39_v0, 32  ;;  %v1295_v2 = vld [vmem:[%s2042_s2] sm:$0xff]   ;;  %v1296_v9 = vld [vmem:[%s2042_s2 + $0x8] sm:$0xff]   ;;  %v1349_v39 = vmov 2475754826  }
  0x11   :  { %1234 = vmatprep.mubr.msk.bf16.mxu0 %vm89_vm0, %v1295_v2  ;;  %v1350_v41 = vmov 2131351028   ;;  %v1351_v43 = vmov 2102212464   ;;  %v1352_v45 = vmov 920167782  }
  0x12   :  { %v1353_v52 = vmov 1326507024   ;;  %v1297_v58 = vld [vmem:[%s2043_s3] sm:$0xff]  }
  0x13   :  { %1242 = vmatprep.mubr.msk.bf16.mxu1 %vm89_vm0, %v1297_v58 }
  0x14   :  { %42 = vxpose.xlu0.b32.end [2/2] (short) (narrow) %v40_v1, 32 }
  0x8c   :  { %v1404_v3 = vpop.trf.xlu0 }
  0x90   :  { %v1406_v4 = vpop.trf.xlu0 }
  0x91   :  { %v77_v8 = vpack.c.bf16 %v1406_v4, %v1404_v3 }
  0x94   :  { %v1408_v5 = vpop.trf.xlu0 }
  0x98   :  { %v1410_v6 = vpop.trf.xlu0 }
  0x99   :  { %v78_v7 = vpack.c.bf16 %v1410_v6, %v1408_v5 }
  0x9b   :  { %1230 = vmatprep.subr.bf16.mxu0 %v78_v7 }
  0x9c   :  { %1231 = vmatpush3.bf16.msra.mxu0 %v78_v7 }
  0x9d   :  { %1232 = vmatprep.subr.bf16.mxu0 %v77_v8 }
  0xa0   :  { %1233 = vmatpush3.bf16.msra.mxu0 %v77_v8 }
  0xa3   :  { %1235 = vmatmul.mubr.msk.bf16.vlgmr.msra.gmra.mxu0 %vm89_vm0, %v1296_v9 }
 0x163   :  { %v1420_v10 = vpop.f32.mrf.mxu0 }
 0x164   :  { %v353_v11 = vand.u32 2147483647, %v1420_v10  ;;  %v356_v12 = vand.u32 2139095040, %v1420_v10 }
 0x165   :  { %v1424_v13 = vpop.f32.mrf.mxu0 }
 0x166   :  { %v357_v14 = vshrl.u32 %v356_v12, 23  ;;  %v360_v15 = vand.u32 8388607, %v353_v11  ;;  %v145_v16 = vand.u32 2147483647, %v1424_v13  ;;  %v148_v17 = vand.u32 2139095040, %v1424_v13 }
 0x167   :  { %v1430_v18 = vpop.f32.mrf.mxu0 }
 0x168   :  { %v1187_v19 = vadd.s32 4294967169, %v357_v14  ;;  %v149_v20 = vshrl.u32 %v148_v17, 23  ;;  %v152_v21 = vand.u32 8388607, %v145_v16  ;;  %v460_v22 = vand.u32 2139095040, %v1430_v18 }
 0x169   :  { %v361_v24 = vor.u32 8388608, %v360_v15  ;;  %v457_v34 = vand.u32 2147483647, %v1430_v18 }
 0x16a   :  { %v363_v23 = vadd.s32 1, %v1187_v19  ;;  %v1179_v25 = vadd.s32 4294967169, %v149_v20  ;;  %v153_v26 = vor.u32 8388608, %v152_v21  ;;  %v461_v27 = vshrl.u32 %v460_v22, 23 }
 0x16b   :  { %v1435_v32 = vshll.u32 %v361_v24, 8 }
 0x16c   :  { %vm364_vm1 = vcmp.gt.s32.totalorder %v363_v23, 0  ;;  %v155_v29 = vadd.s32 1, %v1179_v25  ;;  %v1437_v33 = vshll.u32 %v153_v26, 8  ;;  %v1191_v35 = vadd.s32 4294967169, %v461_v27 }
 0x16d   :  { %v365_v28 = vsel %vm364_vm1, %v363_v23, 0 }
 0x16e   :  { %v366_v30 = vshrl.u32 %v365_v28, 5  ;;  %v367_v31 = vand.u32 31, %v365_v28  ;;  %vm156_vm2 = vcmp.gt.s32.totalorder %v155_v29, 0  ;;  %v467_v17 = vadd.s32 1, %v1191_v35 }
 0x16f   :  { %v157_v57 = vsel %vm156_vm2, %v155_v29, 0 }
 0x170   :  { %v368_v36 = vsub.s32 32, %v367_v31  ;;  %v370_v38 = vshll.u32 %v1348_v37, %v367_v31  ;;  %v373_v40 = vshll.u32 %v1349_v39, %v367_v31  ;;  %v376_v42 = vshll.u32 %v1350_v41, %v367_v31 }
 0x171   :  { %v379_v44 = vshll.u32 %v1351_v43, %v367_v31  ;;  %v382_v46 = vshll.u32 %v1352_v45, %v367_v31  ;;  %vm385_vm3 = vcmp.lt.s32.totalorder %v366_v30, 1  ;;  %vm386_vm4 = vcmp.lt.s32.totalorder %v366_v30, 2 }
 0x172   :  { %v371_v47 = vshrl.u32 %v1349_v39, %v368_v36  ;;  %v374_v48 = vshrl.u32 %v1350_v41, %v368_v36  ;;  %v377_v49 = vshrl.u32 %v1351_v43, %v368_v36  ;;  %v369_v50 = vshrl.u32 %v1348_v37, %v368_v36 }
 0x173   :  { %v380_v51 = vshrl.u32 %v1352_v45, %v368_v36  ;;  %v383_v53 = vshrl.u32 %v1353_v52, %v368_v36  ;;  %vm387_vm5 = vcmp.lt.s32.totalorder %v366_v30, 3  ;;  %vm388_vm6 = vcmp.lt.s32.totalorder %v366_v30, 4 }
 0x174   :  { %v372_v54 = vor.u32 %v371_v47, %v370_v38  ;;  %v375_v55 = vor.u32 %v374_v48, %v373_v40  ;;  %v378_v56 = vor.u32 %v377_v49, %v376_v42  ;;  %v159_v61 = vand.u32 31, %v157_v57 }
 0x175   :  { %v381_v59 = vor.u32 %v380_v51, %v379_v44  ;;  %v384_v60 = vor.u32 %v383_v53, %v382_v46  ;;  %v158_v21 = vshrl.u32 %v157_v57, 5  ;;  %vm468_vm12 = vcmp.gt.s32.totalorder %v467_v17, 0 }
 0x176   :  { %v389_v62 = vsel %vm385_vm3, %v369_v50, %v372_v54  ;;  %v390_v63 = vsel %vm388_vm6, %v378_v56, 2102212464  ;;  %v393_v0 = vsel %vm385_vm3, %v372_v54, %v375_v55  ;;  %v397_v1 = vsel %vm385_vm3, %v375_v55, %v378_v56 }
 0x177   :  { %v391_v2 = vsel %vm387_vm5, %v375_v55, %v390_v63  ;;  %v394_v7 = vsel %vm388_vm6, %v381_v59, 920167782  ;;  %v398_v8 = vsel %vm388_vm6, %v384_v60, 1326507024  ;;  %v160_v9 = vsub.s32 32, %v159_v61 }
 0x178   :  { %v392_v12 = vsel %vm386_vm4, %v389_v62, %v391_v2  ;;  %v395_v14 = vsel %vm387_vm5, %v378_v56, %v394_v7  ;;  %v399_v15 = vsel %vm387_vm5, %v381_v59, %v398_v8  ;;  %v162_v22 = vshll.u32 %v1348_v37, %v159_v61  ;;  %v1497_v8 = vpop.f32.mrf.mxu0 }
 0x179   :  { %v396_v19 = vsel %vm386_vm4, %v393_v0, %v395_v14  ;;  %v400_v20 = vsel %vm386_vm4, %v397_v1, %v399_v15  ;;  %v408_v27 = vmul.u32 %v1435_v32, %v392_v12  ;;  %v163_v28 = vshrl.u32 %v1349_v39, %v160_v9 }
 0x17a   :  { %v1467_v23 = vmul.u32.u64.low %v1435_v32, %v400_v20  ;;  %v1468_v24 = vmul.u32.u64.high %v1435_v32, %v400_v20, %v1467_v23  ;;  %v1471_v25 = vmul.u32.u64.low %v1435_v32, %v396_v19  ;;  %v1472_v26 = vmul.u32.u64.high %v1435_v32, %v396_v19, %v1471_v25 }
 0x17b   :  { %v165_v29 = vshll.u32 %v1349_v39, %v159_v61  ;;  %v166_v30 = vshrl.u32 %v1350_v41, %v160_v9  ;;  %v168_v31 = vshll.u32 %v1350_v41, %v159_v61  ;;  %v169_v35 = vshrl.u32 %v1351_v43, %v160_v9 }
 0x17c   :  { %v171_v36 = vshll.u32 %v1351_v43, %v159_v61  ;;  %v172_v38 = vshrl.u32 %v1352_v45, %v160_v9  ;;  %v164_v40 = vor.u32 %v163_v28, %v162_v22  ;;  %v174_v44 = vshll.u32 %v1352_v45, %v159_v61 }
 0x17d   :  { %v167_v42 = vor.u32 %v166_v30, %v165_v29  ;;  %v175_v32 = vshrl.u32 %v1353_v52, %v160_v9  ;;  %vm410_vm7 = vc.u32 %v1468_v24, %v1471_v25  ;;  %v411_v46 = vadd.s32 1, %v1472_v26 }
 0x17e   :  { %v161_v47 = vshrl.u32 %v1348_v37, %v160_v9  ;;  %v170_v48 = vor.u32 %v169_v35, %v168_v31  ;;  %v173_v49 = vor.u32 %v172_v38, %v171_v36  ;;  %vm177_vm8 = vcmp.lt.s32.totalorder %v158_v21, 1 }
 0x17f   :  { %v176_v50 = vor.u32 %v175_v32, %v174_v44  ;;  %vm178_vm9 = vcmp.lt.s32.totalorder %v158_v21, 2  ;;  %v412_v51 = vsel %vm410_vm7, %v411_v46, %v1472_v26  ;;  %vm179_vm10 = vcmp.lt.s32.totalorder %v158_v21, 3 }
 0x180   :  { %vm180_vm11 = vcmp.lt.s32.totalorder %v158_v21, 4  ;;  %v185_v53 = vsel %vm177_vm8, %v164_v40, %v167_v42  ;;  %v413_v54 = vadd.s32 %v412_v51, %v408_v27  ;;  %v189_v57 = vsel %vm177_vm8, %v167_v42, %v170_v48 }
 0x181   :  { %v182_v55 = vsel %vm180_vm11, %v170_v48, 2102212464  ;;  %v186_v56 = vsel %vm180_vm11, %v173_v49, 920167782  ;;  %v181_v58 = vsel %vm177_vm8, %v161_v47, %v164_v40  ;;  %v190_v60 = vsel %vm180_vm11, %v176_v50, 1326507024 }
 0x182   :  { %v187_v59 = vsel %vm179_vm10, %v170_v48, %v186_v56  ;;  %v414_v61 = vadd.s32 536870912, %v413_v54  ;;  %v183_v62 = vsel %vm179_vm10, %v167_v42, %v182_v55  ;;  %v191_v0 = vsel %vm179_vm10, %v173_v49, %v190_v60 }
 0x183   :  { %v188_v63 = vsel %vm178_vm9, %v185_v53, %v187_v59  ;;  %v192_v1 = vsel %vm178_vm9, %v189_v57, %v191_v0  ;;  %v469_v15 = vsel %vm468_vm12, %v467_v17, 0  ;;  %v184_v19 = vsel %vm178_vm9, %v181_v58, %v183_v62 }
 0x184   :  { %v1493_v2 = vmul.u32.u64.low %v1437_v33, %v188_v63  ;;  %v1494_v7 = vmul.u32.u64.high %v1437_v33, %v188_v63, %v1493_v2  ;;  %v1499_v9 = vshrl.u32 %v414_v61, 30  ;;  %v464_v20 = vand.u32 8388607, %v457_v34 }
 0x185   :  { %v1502_v12 = vmul.u32.u64.low %v1437_v33, %v192_v1  ;;  %v1503_v14 = vmul.u32.u64.high %v1437_v33, %v192_v1, %v1502_v12  ;;  %v471_v22 = vand.u32 31, %v469_v15  ;;  %v252_v26 = vand.u32 2139095040, %v1497_v8 }
 0x186   :  { %v416_v23 = vshll.u32 %v1499_v9, 30  ;;  %v203_v27 = vadd.s32 1, %v1494_v7  ;;  %v200_v30 = vmul.u32 %v1437_v33, %v184_v19  ;;  %v465_v21 = vor.u32 8388608, %v464_v20 }
 0x187   :  { %v472_v28 = vsub.s32 32, %v471_v22  ;;  %vm202_vm13 = vc.u32 %v1503_v14, %v1493_v2  ;;  %v253_v40 = vshrl.u32 %v252_v26, 23  ;;  %v1517_v42 = vshrl.u32 %v469_v15, 5 }
 0x188   :  { %v417_v29 = vsub.s32 %v413_v54, %v416_v23  ;;  %v204_v17 = vsel %vm202_vm13, %v203_v27, %v1494_v7  ;;  %v474_v44 = vshll.u32 %v1348_v37, %v471_v22  ;;  %v477_v32 = vshll.u32 %v1349_v39, %v471_v22 }
 0x189   :  { %v475_v31 = vshrl.u32 %v1349_v39, %v472_v28  ;;  %v205_v36 = vadd.s32 %v204_v17, %v200_v30  ;;  %v478_v38 = vshrl.u32 %v1350_v41, %v472_v28  ;;  %v481_v33 = vshrl.u32 %v1351_v43, %v472_v28 }
 0x18a   :  { %v419_v35 = vsub.s32 0, %v417_v29  ;;  %v483_v48 = vshll.u32 %v1351_v43, %v471_v22  ;;  %v484_v49 = vshrl.u32 %v1352_v45, %v472_v28  ;;  %v480_v51 = vshll.u32 %v1350_v41, %v471_v22 }
 0x18b   :  { %v206_v47 = vadd.s32 536870912, %v205_v36  ;;  %v476_v50 = vor.u32 %v475_v31, %v474_v44  ;;  %v486_v53 = vshll.u32 %v1352_v45, %v471_v22  ;;  %v487_v54 = vshrl.u32 %v1353_v52, %v472_v28 }
 0x18c   :  { %v1188_v46 = vmin.u32 %v419_v35, %v417_v29  ;;  %v479_v57 = vor.u32 %v478_v38, %v477_v32  ;;  %v485_v58 = vor.u32 %v484_v49, %v483_v48  ;;  %v482_v59 = vor.u32 %v481_v33, %v480_v51 }
 0x18d   :  { %v1527_v56 = vshrl.u32 %v206_v47, 30  ;;  %v488_v60 = vor.u32 %v487_v54, %v486_v53  ;;  %v249_v61 = vand.u32 2147483647, %v1497_v8  ;;  %vm492_vm14 = vcmp.lt.s32.totalorder %v1517_v42, 4 }
 0x18e   :  { %v421_v55 = vclz %v1188_v46  ;;  %v505_v0 = vshll.u32 %v465_v21, 8  ;;  %v409_v1 = vadd.s32 %v1471_v25, %v1468_v24  ;;  %vm489_vm15 = vcmp.lt.s32.totalorder %v1517_v42, 1 }
 0x18f   :  { %v208_v63 = vshll.u32 %v1527_v56, 30  ;;  %v498_v7 = vsel %vm492_vm14, %v485_v58, 920167782  ;;  %v1183_v12 = vadd.s32 4294967169, %v253_v40  ;;  %vm491_vm2 = vcmp.lt.s32.totalorder %v1517_v42, 3 }
 0x190   :  { %v1189_v62 = vadd.s32 4294967294, %v421_v55  ;;  %v497_v19 = vsel %vm489_vm15, %v476_v50, %v479_v57  ;;  %v499_v22 = vsel %vm491_vm2, %v482_v59, %v498_v7  ;;  %v501_v24 = vsel %vm489_vm15, %v479_v57, %v482_v59 }
 0x191   :  { %v1537_v15 = vsub.s32 %v205_v36, %v208_v63  ;;  %v502_v25 = vsel %vm492_vm14, %v488_v60, 1326507024  ;;  %v473_v27 = vshrl.u32 %v1348_v37, %v472_v28  ;;  %vm490_vm3 = vcmp.lt.s32.totalorder %v1517_v42, 2 }
 0x192   :  { %vm1190_vm1 = vcmp.lt.s32.totalorder %v1189_v62, 0  ;;  %v494_v21 = vsel %vm492_vm14, %v482_v59, 2102212464  ;;  %v503_v31 = vsel %vm491_vm2, %v485_v58, %v502_v25  ;;  %v500_v38 = vsel %vm490_vm3, %v497_v19, %v499_v22 }
 0x193   :  { %v424_v20 = vsel %vm1190_vm1, 0, %v1189_v62  ;;  %v211_v17 = vsub.s32 0, %v1537_v15  ;;  %v504_v40 = vsel %vm490_vm3, %v501_v24, %v503_v31  ;;  %v439_v28 = vsub.s32 4, %v1499_v9 }
 0x194   :  { %v425_v23 = vsub.s32 32, %v424_v20  ;;  %v429_v26 = vsub.s32 4294967266, %v424_v20  ;;  %v426_v30 = vshll.u32 %v417_v29, %v424_v20  ;;  %v259_v32 = vadd.s32 1, %v1183_v12 }
 0x195   :  { %v1560_v44 = vmul.u32.u64.low %v505_v0, %v504_v40  ;;  %v1561_v29 = vmul.u32.u64.high %v505_v0, %v504_v40, %v1560_v44  ;;  %v493_v47 = vsel %vm489_vm15, %v473_v27, %v476_v50  ;;  %v495_v48 = vsel %vm491_vm2, %v479_v57, %v494_v21 }
 0x196   :  { %v427_v35 = vshrl.u32 %v409_v1, %v425_v23  ;;  %v430_v36 = vadd.s32 127, %v429_v26  ;;  %v1180_v49 = vmin.u32 %v211_v17, %v1537_v15  ;;  %vm260_vm4 = vcmp.gt.s32.totalorder %v259_v32, 0 }
 0x197   :  { %v1568_v51 = vmul.u32.u64.low %v505_v0, %v500_v38  ;;  %v1569_v53 = vmul.u32.u64.high %v505_v0, %v500_v38, %v1568_v51  ;;  %vm355_vm5 = vcmp.lt.s32.totalorder %v1420_v10, 0  ;;  %v261_v55 = vsel %vm260_vm4, %v259_v32, 0 }
 0x198   :  { %v428_v33 = vor.u32 %v427_v35, %v426_v30  ;;  %v431_v46 = vshll.u32 %v430_v36, 23  ;;  %v440_v58 = vsel %vm355_vm5, %v439_v28, %v1499_v9  ;;  %v496_v50 = vsel %vm490_vm3, %v493_v47, %v495_v48 }
 0x199   :  { %v263_v59 = vand.u32 31, %v261_v55  ;;  %vm514_vm6 = vc.u32 %v1561_v29, %v1568_v51  ;;  %vm1582_vm7 = vcmp.le.f32.partialorder %v353_v11, 0.7853982  ;;  %v213_v63 = vclz %v1180_v49 }
 0x19a   :  { %v432_v54 = vor.u32 4788187, %v431_v46  ;;  %v435_v60 = vcvt.s32.f32 %v428_v33  ;;  %v515_v1 = vadd.s32 1, %v1569_v53  ;;  %v256_v9 = vand.u32 8388607, %v249_v61 }
 0x19b   :  { %v442_v7 = vsel %vm1582_vm7, 0, %v440_v58  ;;  %v512_v12 = vmul.u32 %v505_v0, %v496_v50  ;;  %v264_v19 = vsub.s32 32, %v263_v59  ;;  %v1181_v25 = vadd.s32 4294967294, %v213_v63 }
 0x19c   :  { %v433_v57 = vand.u32 2147483647, %v432_v54  ;;  %v516_v20 = vsel %vm514_vm6, %v515_v1, %v1569_v53  ;;  %v446_v24 = vadd.s32 3, %v442_v7  ;;  %v257_v23 = vor.u32 8388608, %v256_v9 }
 0x19d   :  { %v517_v11 = vadd.s32 %v516_v20, %v512_v12  ;;  %v262_v26 = vshrl.u32 %v261_v55, 5  ;;  %v267_v17 = vshrl.u32 %v1349_v39, %v264_v19  ;;  %v270_v21 = vshrl.u32 %v1350_v41, %v264_v19 }
 0x19e   :  { %v436_v42 = vmul.f32 %v435_v60, %v433_v57  ;;  %v266_v31 = vshll.u32 %v1348_v37, %v263_v59  ;;  %v269_v35 = vshll.u32 %v1349_v39, %v263_v59  ;;  %v273_v36 = vshrl.u32 %v1351_v43, %v264_v19 }
 0x19f   :  { %v518_v30 = vadd.s32 536870912, %v517_v11  ;;  %v272_v40 = vshll.u32 %v1350_v41, %v263_v59  ;;  %v275_v28 = vshll.u32 %v1351_v43, %v263_v59  ;;  %v276_v44 = vshrl.u32 %v1352_v45, %v264_v19 }
 0x1a0   :  { %v437_v22 = vxor.u32 2147483648, %v436_v42  ;;  %v278_v32 = vshll.u32 %v1352_v45, %v263_v59  ;;  %v279_v33 = vshrl.u32 %v1353_v52, %v264_v19  ;;  %vm1182_vm8 = vcmp.lt.s32.totalorder %v1181_v25, 0 }
 0x1a1   :  { %v1602_v38 = vshrl.u32 %v518_v30, 30  ;;  %v268_v47 = vor.u32 %v267_v17, %v266_v31  ;;  %v271_v48 = vor.u32 %v270_v21, %v269_v35  ;;  %v274_v49 = vor.u32 %v273_v36, %v272_v40 }
 0x1a2   :  { %v438_v27 = vsel %vm355_vm5, %v437_v22, %v436_v42  ;;  %v277_v53 = vor.u32 %v276_v44, %v275_v28  ;;  %v280_v54 = vor.u32 %v279_v33, %v278_v32  ;;  %v1610_v55 = vstv %s37_s9 }
 0x1a3   :  { %v441_v0 = vsel %vm1582_vm7, %v1420_v10, %v438_v27  ;;  %v520_v46 = vshll.u32 %v1602_v38, 30  ;;  %v297_v50 = vshll.u32 %v257_v23, 8  ;;  %v1612_v57 = vsel %vm1182_vm8, 0, %v1181_v25 }
 0x1a4   :  { %1301 = vcosq.f32 %v441_v0  ;;  %v265_v60 = vshrl.u32 %v1348_v37, %v264_v19  ;;  %vm281_vm9 = vcmp.lt.s32.totalorder %v262_v26, 1  ;;  %v447_v59 = vand.u32 3, %v446_v24 }
 0x1a5   :  { %1303 = vsinq.f32 %v441_v0  ;;  %v521_v58 = vsub.s32 %v517_v11, %v520_v46  ;;  %vm283_vm10 = vcmp.lt.s32.totalorder %v262_v26, 3  ;;  %vm284_vm11 = vcmp.lt.s32.totalorder %v262_v26, 4 }
 0x1a6   :  { %v289_v63 = vsel %vm281_vm9, %v268_v47, %v271_v48  ;;  %v286_v1 = vsel %vm284_vm11, %v274_v49, 2102212464  ;;  %v290_v9 = vsel %vm284_vm11, %v277_v53, 920167782  ;;  %v293_v42 = vsel %vm281_vm9, %v271_v48, %v274_v49 }
 0x1a7   :  { %v523_v62 = vsub.s32 0, %v521_v58  ;;  %v294_v7 = vsel %vm284_vm11, %v280_v54, 1326507024  ;;  %vm282_vm12 = vcmp.lt.s32.totalorder %v262_v26, 2  ;;  %v291_v20 = vsel %vm283_vm10, %v274_v49, %v290_v9 }
 0x1a8   :  { %v295_v22 = vsel %vm283_vm10, %v277_v53, %v294_v7  ;;  %v221_v11 = vsub.s32 4294967266, %v1612_v57  ;;  %v285_v25 = vsel %vm281_vm9, %v265_v60, %v268_v47  ;;  %v292_v19 = vsel %vm282_vm12, %v289_v63, %v291_v20 }
 0x1a9   :  { %v1192_v12 = vmin.u32 %v523_v62, %v521_v58  ;;  %v296_v24 = vsel %vm282_vm12, %v293_v42, %v295_v22  ;;  %v287_v27 = vsel %vm283_vm10, %v271_v48, %v286_v1  ;;  %v564_v21 = vmul.f32 %v1610_v55, %v1408_v5 }
 0x1aa   :  { %v1621_v30 = vmul.u32.u64.low %v297_v50, %v296_v24  ;;  %v1622_v17 = vmul.u32.u64.high %v297_v50, %v296_v24, %v1621_v30  ;;  %v1626_v0 = vmul.u32.u64.low %v297_v50, %v292_v19  ;;  %v1627_v31 = vmul.u32.u64.high %v297_v50, %v292_v19, %v1626_v0 }
 0x1ab   :  { %v525_v23 = vclz %v1192_v12  ;;  %v201_v35 = vadd.s32 %v1493_v2, %v1503_v14  ;;  %v513_v36 = vadd.s32 %v1568_v51, %v1561_v29  ;;  %vm445_vm13 = vweird.f32 %v1420_v10 }
 0x1ac   :  { %v222_v44 = vadd.s32 127, %v221_v11  ;;  %v288_v32 = vsel %vm282_vm12, %v285_v25, %v287_v27  ;;  %vm448_vm14 = vcmp.lt.s32.totalorder %v447_v59, 2  ;;  %vm449_vm15 = vcmp.eq.s32.totalorder %v447_v59, 0 }
 0x1ad   :  { %v1193_v40 = vadd.s32 4294967294, %v525_v23  ;;  %v217_v33 = vsub.s32 32, %v1612_v57  ;;  %vm306_vm2 = vc.u32 %v1622_v17, %v1626_v0  ;;  %v307_v29 = vadd.s32 1, %v1627_v31 }
 0x1ae   :  { %vm452_vm3 = vcmp.eq.s32.totalorder %v447_v59, 2  ;;  %v304_v48 = vmul.u32 %v297_v50, %v288_v32  ;;  %v223_v49 = vshll.u32 %v222_v44, 23  ;;  %vm459_vm4 = vcmp.lt.s32.totalorder %v1430_v18, 0 }
 0x1af   :  { %vm1194_vm1 = vcmp.lt.s32.totalorder %v1193_v40, 0  ;;  %v308_v54 = vsel %vm306_vm2, %v307_v29, %v1627_v31  ;;  %v219_v42 = vshrl.u32 %v201_v35, %v217_v33  ;;  %vm1656_vm5 = vcmp.le.f32.partialorder %v457_v34, 0.7853982 }
 0x1b0   :  { %v528_v14 = vsel %vm1194_vm1, 0, %v1193_v40  ;;  %v309_v1 = vadd.s32 %v308_v54, %v304_v48  ;;  %v224_v11 = vor.u32 4788187, %v223_v49  ;;  %vm147_vm7 = vcmp.lt.s32.totalorder %v1424_v13, 0 }
 0x1b1   :  { %v1302_v28 = vpop.eup %1301  ;;  %v529_v46 = vsub.s32 32, %v528_v14  ;;  %v533_v47 = vsub.s32 4294967266, %v528_v14  ;;  %v530_v53 = vshll.u32 %v521_v58, %v528_v14  ;;  %v218_v58 = vshll.u32 %v1537_v15, %v1612_v57 }
 0x1b2   :  { %v1304_v5 = vpop.eup %1303  ;;  %v453_v2 = vxor.u32 2147483648, %v1302_v28  ;;  %v310_v22 = vadd.s32 536870912, %v309_v1  ;;  %v225_v30 = vand.u32 2147483647, %v224_v11  ;;  %vm1673_vm8 = vcmp.le.f32.partialorder %v145_v16, 0.7853982 }
 0x1b3   :  { %v450_v51 = vxor.u32 2147483648, %v1304_v5  ;;  %v531_v62 = vshrl.u32 %v513_v36, %v529_v46  ;;  %v534_v63 = vadd.s32 127, %v533_v47  ;;  %v220_v24 = vor.u32 %v219_v42, %v218_v58 }
 0x1b4   :  { %v454_v26 = vsel %vm452_vm3, %v453_v2, %v1304_v5  ;;  %v1649_v19 = vshrl.u32 %v310_v22, 30  ;;  %v305_v46 = vadd.s32 %v1626_v0, %v1622_v17  ;;  %v231_v16 = vsub.s32 4, %v1527_v56 }
 0x1b5   :  { %v451_v60 = vsel %vm449_vm15, %v1302_v28, %v450_v51  ;;  %v532_v12 = vor.u32 %v531_v62, %v530_v53  ;;  %v535_v20 = vshll.u32 %v534_v63, 23  ;;  %v227_v35 = vcvt.s32.f32 %v220_v24 }
 0x1b6   :  { %v455_v9 = vsel %vm448_vm14, %v451_v60, %v454_v26  ;;  %v312_v27 = vshll.u32 %v1649_v19, 30  ;;  %v565_v11 = vmul.f32 %v1610_v55, %v1410_v6  ;;  %v232_v24 = vsel %vm147_vm7, %v231_v16, %v1527_v56 }
 0x1b7   :  { %v456_v7 = vsel %vm445_vm13, nan, %v455_v9  ;;  %v536_v25 = vor.u32 4788187, %v535_v20  ;;  %v539_v59 = vcvt.s32.f32 %v532_v12  ;;  %v228_v15 = vmul.f32 %v227_v35, %v225_v30 }
 0x1b8   :  { %v1645_v50 = vadd.f32 %v564_v21, %v456_v7  ;;  %v313_v31 = vsub.s32 %v309_v1, %v312_v27  ;;  %v543_v21 = vsub.s32 4, %v1602_v38  ;;  %vm549_vm12 = vweird.f32 %v1430_v18 }
 0x1b9   :  { %v537_v23 = vand.u32 2147483647, %v536_v25  ;;  %v229_v2 = vxor.u32 2147483648, %v228_v15  ;;  %vm251_vm13 = vcmp.lt.s32.totalorder %v1497_v8, 0  ;;  %v335_v27 = vsub.s32 4, %v1649_v19 }
 0x1ba   :  { %v315_v40 = vsub.s32 0, %v313_v31  ;;  %v544_v33 = vsel %vm459_vm4, %v543_v21, %v1602_v38  ;;  %vm1691_vm14 = vcmp.le.f32.partialorder %v249_v61, 0.7853982  ;;  %v234_v56 = vsel %vm1673_vm8, 0, %v232_v24 }
 0x1bb   :  { %v540_v10 = vmul.f32 %v539_v59, %v537_v23  ;;  %v546_v29 = vsel %vm1656_vm5, 0, %v544_v33  ;;  %v230_v51 = vsel %vm147_vm7, %v229_v2, %v228_v15  ;;  %v238_v61 = vadd.s32 3, %v234_v56 }
 0x1bc   :  { %v1184_v44 = vmin.u32 %v315_v40, %v313_v31  ;;  %v550_v26 = vadd.s32 3, %v546_v29  ;;  %v233_v60 = vsel %vm1673_vm8, %v1424_v13, %v230_v51  ;;  %v563_v38 = vmul.f32 %v1610_v55, %v1406_v4 }
 0x1bd   :  { %v541_v36 = vxor.u32 2147483648, %v540_v10  ;;  %v239_v57 = vand.u32 3, %v238_v61  ;;  %vm341_vm7 = vweird.f32 %v1497_v8 }
 0x1be   :  { %v317_v5 = vclz %v1184_v44  ;;  %v551_v1 = vand.u32 3, %v550_v26  ;;  %v562_v26 = vmul.f32 %v1610_v55, %v1404_v3 }
 0x1bf   :  { %v542_v28 = vsel %vm459_vm4, %v541_v36, %v540_v10  ;;  %v336_v36 = vsel %vm251_vm13, %v335_v27, %v1649_v19  ;;  %vm241_vm15 = vcmp.eq.s32.totalorder %v239_v57, 0  ;;  %vm244_vm1 = vcmp.eq.s32.totalorder %v239_v57, 2 }
 0x1c0   :  { %v545_v32 = vsel %vm1656_vm5, %v1430_v18, %v542_v28  ;;  %v1185_v14 = vadd.s32 4294967294, %v317_v5  ;;  %vm556_vm9 = vcmp.eq.s32.totalorder %v551_v1, 2  ;;  %vm553_vm10 = vcmp.eq.s32.totalorder %v551_v1, 0 }
 0x1c1   :  { %1305 = vcosq.f32 %v545_v32  ;;  %vm552_vm11 = vcmp.lt.s32.totalorder %v551_v1, 2  ;;  %v338_v15 = vsel %vm1691_vm14, 0, %v336_v36  ;;  %vm240_vm2 = vcmp.lt.s32.totalorder %v239_v57, 2 }
 0x1c2   :  { %1307 = vsinq.f32 %v545_v32  ;;  %vm1186_vm6 = vcmp.lt.s32.totalorder %v1185_v14, 0  ;;  %v342_v28 = vadd.s32 3, %v338_v15  ;;  %vm237_vm4 = vweird.f32 %v1424_v13 }
 0x1c3   :  { %v320_v34 = vsel %vm1186_vm6, 0, %v1185_v14  ;;  %1309 = vcosq.f32 %v233_v60 }
 0x1c4   :  { %v321_v47 = vsub.s32 32, %v320_v34  ;;  %v325_v48 = vsub.s32 4294967266, %v320_v34  ;;  %v322_v49 = vshll.u32 %v313_v31, %v320_v34  ;;  %1311 = vsinq.f32 %v233_v60 }
 0x1c5   :  { %v343_v5 = vand.u32 3, %v342_v28 }
 0x1c6   :  { %v323_v53 = vshrl.u32 %v305_v46, %v321_v47  ;;  %v326_v54 = vadd.s32 127, %v325_v48 }
 0x1c7   :  { %vm348_vm3 = vcmp.eq.s32.totalorder %v343_v5, 2  ;;  %vm345_vm5 = vcmp.eq.s32.totalorder %v343_v5, 0  ;;  %vm344_vm6 = vcmp.lt.s32.totalorder %v343_v5, 2 }
 0x1c8   :  { %v324_v62 = vor.u32 %v323_v53, %v322_v49  ;;  %v327_v63 = vshll.u32 %v326_v54, 23 }
 0x1ca   :  { %v328_v17 = vor.u32 4788187, %v327_v63  ;;  %v331_v7 = vcvt.s32.f32 %v324_v62  ;;  %v1298_v62 = vld [vmem:[%s2043_s3 + $0x8] sm:$0xff]   ;;  %s1174_s3 = sld [smem:[#allocation2 + $0x1]] }
 0x1cc   :  { %v329_v42 = vand.u32 2147483647, %v328_v17 }
 0x1ce   :  { %v1306_v0 = vpop.eup %1305  ;;  %v332_v22 = vmul.f32 %v331_v7, %v329_v42 }
 0x1cf   :  { %v1308_v9 = vpop.eup %1307  ;;  %v557_v12 = vxor.u32 2147483648, %v1306_v0 }
 0x1d0   :  { %v554_v20 = vxor.u32 2147483648, %v1308_v9  ;;  %v333_v23 = vxor.u32 2147483648, %v332_v22  ;;  %v1310_v40 = vpop.eup %1309 }
 0x1d1   :  { %v558_v58 = vsel %vm556_vm9, %v557_v12, %v1308_v9  ;;  %v1312_v21 = vpop.eup %1311  ;;  %v245_v32 = vxor.u32 2147483648, %v1310_v40 }
 0x1d2   :  { %v555_v25 = vsel %vm553_vm10, %v1306_v0, %v554_v20  ;;  %v334_v6 = vsel %vm251_vm13, %v333_v23, %v332_v22  ;;  %v242_v44 = vxor.u32 2147483648, %v1312_v21 }
 0x1d3   :  { %v559_v59 = vsel %vm552_vm11, %v555_v25, %v558_v58  ;;  %v337_v18 = vsel %vm1691_vm14, %v1497_v8, %v334_v6  ;;  %v246_v2 = vsel %vm244_vm1, %v245_v32, %v1312_v21 }
 0x1d4   :  { %v560_v30 = vsel %vm549_vm12, nan, %v559_v59  ;;  %1313 = vcosq.f32 %v337_v18  ;;  %v243_v33 = vsel %vm241_vm15, %v1310_v40, %v242_v44 }
 0x1d5   :  { %v1695_v31 = vadd.f32 %v565_v11, %v560_v30  ;;  %1315 = vsinq.f32 %v337_v18  ;;  %v247_v29 = vsel %vm240_vm2, %v243_v33, %v246_v2 }
 0x1d6   :  { %v248_v47 = vsel %vm237_vm4, nan, %v247_v29 }
 0x1d7   :  { %v575_v35 = vpack.c.bf16 %v1695_v31, %v1645_v50  ;;  %v1713_v54 = vadd.f32 %v562_v26, %v248_v47 }
 0x1d9   :  { %1238 = vmatprep.subr.bf16.mxu1 %v575_v35 }
 0x1da   :  { %1239 = vmatpush3.bf16.msra.mxu1 %v575_v35 }
 0x1e1   :  { %v1314_v14 = vpop.eup %1313 }
 0x1e2   :  { %v1316_v19 = vpop.eup %1315  ;;  %v349_v34 = vxor.u32 2147483648, %v1314_v14 }
 0x1e3   :  { %v346_v51 = vxor.u32 2147483648, %v1316_v19 }
 0x1e4   :  { %v350_v46 = vsel %vm348_vm3, %v349_v34, %v1316_v19 }
 0x1e5   :  { %v347_v48 = vsel %vm345_vm5, %v1314_v14, %v346_v51 }
 0x1e6   :  { %v351_v49 = vsel %vm344_vm6, %v347_v48, %v350_v46 }
 0x1e7   :  { %v352_v53 = vsel %vm341_vm7, nan, %v351_v49 }
 0x1e8   :  { %v1715_v60 = vadd.f32 %v563_v38, %v352_v53 }
 0x1ea   :  { %v574_v13 = vpack.c.bf16 %v1715_v60, %v1713_v54 }
 0x1ec   :  { %1240 = vmatprep.subr.bf16.mxu1 %v574_v13 }
 0x1ed   :  { %1241 = vmatpush3.bf16.msra.mxu1 %v574_v13 }
 0x1f0   :  { %1243 = vmatmul.mubr.msk.bf16.vlgmr.msra.gmra.mxu1 %vm89_vm0, %v1298_v62 }
 0x2b0   :  { %v1723_v3 = vpop.f32.mrf.mxu1 }
 0x2b1   :  { %v849_v4 = vand.u32 2147483647, %v1723_v3  ;;  %v852_v8 = vand.u32 2139095040, %v1723_v3  ;;  %vm851_vm7 = vcmp.lt.s32.totalorder %v1723_v3, 0 }
 0x2b2   :  { %v1727_v55 = vpop.f32.mrf.mxu1 }
 0x2b3   :  { %v853_v63 = vshrl.u32 %v852_v8, 23  ;;  %v856_v1 = vand.u32 8388607, %v849_v4  ;;  %v641_v17 = vand.u32 2147483647, %v1727_v55  ;;  %v644_v0 = vand.u32 2139095040, %v1727_v55 }
 0x2b4   :  { %v1733_v9 = vpop.f32.mrf.mxu1 }
 0x2b5   :  { %v1207_v16 = vadd.s32 4294967169, %v853_v63  ;;  %v953_v42 = vand.u32 2147483647, %v1733_v9  ;;  %v645_v7 = vshrl.u32 %v644_v0, 23  ;;  %v648_v12 = vand.u32 8388607, %v641_v17 }
 0x2b6   :  { %v956_v20 = vand.u32 2139095040, %v1733_v9  ;;  %v857_v22 = vor.u32 8388608, %v856_v1  ;;  %v1743_v59 = vpop.f32.mrf.mxu1 }
 0x2b7   :  { %v859_v58 = vadd.s32 1, %v1207_v16  ;;  %v1199_v11 = vadd.s32 4294967169, %v645_v7  ;;  %v649_v25 = vor.u32 8388608, %v648_v12  ;;  %v1741_v23 = vand.u32 8388607, %v953_v42 }
 0x2b8   :  { %v957_v24 = vshrl.u32 %v956_v20, 23  ;;  %v1745_v18 = vshll.u32 %v857_v22, 8  ;;  %v745_v35 = vand.u32 2147483647, %v1743_v59  ;;  %v748_v40 = vand.u32 2139095040, %v1743_v59 }
 0x2b9   :  { %vm860_vm8 = vcmp.gt.s32.totalorder %v859_v58, 0  ;;  %v651_v30 = vadd.s32 1, %v1199_v11  ;;  %v1748_v36 = vshll.u32 %v649_v25, 8  ;;  %v961_v61 = vor.u32 8388608, %v1741_v23 }
 0x2ba   :  { %v861_v27 = vsel %vm860_vm8, %v859_v58, 0  ;;  %v1211_v10 = vadd.s32 4294967169, %v957_v24 }
 0x2bb   :  { %v862_v6 = vshrl.u32 %v861_v27, 5  ;;  %v863_v56 = vand.u32 31, %v861_v27  ;;  %vm652_vm9 = vcmp.gt.s32.totalorder %v651_v30, 0 }
 0x2bc   :  { %v1754_v28 = vadd.s32 1, %v1211_v10  ;;  %v653_v48 = vsel %vm652_vm9, %v651_v30, 0 }
 0x2bd   :  { %v864_v21 = vsub.s32 32, %v863_v56  ;;  %v866_v15 = vshll.u32 %v1348_v37, %v863_v56  ;;  %v869_v57 = vshll.u32 %v1349_v39, %v863_v56  ;;  %v872_v44 = vshll.u32 %v1350_v41, %v863_v56 }
 0x2be   :  { %v875_v32 = vshll.u32 %v1351_v43, %v863_v56  ;;  %v878_v5 = vshll.u32 %v1352_v45, %v863_v56  ;;  %vm881_vm10 = vcmp.lt.s32.totalorder %v862_v6, 1  ;;  %vm882_vm11 = vcmp.lt.s32.totalorder %v862_v6, 2 }
 0x2bf   :  { %v867_v33 = vshrl.u32 %v1349_v39, %v864_v21  ;;  %v870_v2 = vshrl.u32 %v1350_v41, %v864_v21  ;;  %v873_v14 = vshrl.u32 %v1351_v43, %v864_v21  ;;  %v865_v19 = vshrl.u32 %v1348_v37, %v864_v21 }
 0x2c0   :  { %v876_v29 = vshrl.u32 %v1352_v45, %v864_v21  ;;  %v879_v34 = vshrl.u32 %v1353_v52, %v864_v21  ;;  %vm883_vm12 = vcmp.lt.s32.totalorder %v862_v6, 3  ;;  %vm884_vm13 = vcmp.lt.s32.totalorder %v862_v6, 4 }
 0x2c1   :  { %v868_v51 = vor.u32 %v867_v33, %v866_v15  ;;  %v871_v46 = vor.u32 %v870_v2, %v869_v57  ;;  %v874_v47 = vor.u32 %v873_v14, %v872_v44  ;;  %v655_v49 = vand.u32 31, %v653_v48 }
 0x2c2   :  { %v877_v26 = vor.u32 %v876_v29, %v875_v32  ;;  %v880_v38 = vor.u32 %v879_v34, %v878_v5  ;;  %v654_v22 = vshrl.u32 %v653_v48, 5  ;;  %vm964_vm4 = vcmp.gt.s32.totalorder %v1754_v28, 0 }
 0x2c3   :  { %v885_v53 = vsel %vm881_vm10, %v865_v19, %v868_v51  ;;  %v886_v13 = vsel %vm884_vm13, %v874_v47, 2102212464  ;;  %v889_v62 = vsel %vm881_vm10, %v868_v51, %v871_v46  ;;  %v893_v8 = vsel %vm881_vm10, %v871_v46, %v874_v47 }
 0x2c4   :  { %v887_v63 = vsel %vm883_vm12, %v871_v46, %v886_v13  ;;  %v890_v1 = vsel %vm884_vm13, %v877_v26, 920167782  ;;  %v894_v0 = vsel %vm884_vm13, %v880_v38, 1326507024  ;;  %v656_v16 = vsub.s32 32, %v655_v49 }
 0x2c5   :  { %v888_v7 = vsel %vm882_vm11, %v885_v53, %v887_v63  ;;  %v891_v12 = vsel %vm883_vm12, %v874_v47, %v890_v1  ;;  %v895_v20 = vsel %vm883_vm12, %v877_v26, %v894_v0  ;;  %v658_v24 = vshll.u32 %v1348_v37, %v655_v49 }
 0x2c6   :  { %v892_v58 = vsel %vm882_vm11, %v889_v62, %v891_v12  ;;  %v896_v11 = vsel %vm882_vm11, %v893_v8, %v895_v20  ;;  %v904_v25 = vmul.u32 %v1745_v18, %v888_v7  ;;  %v657_v21 = vshrl.u32 %v1348_v37, %v656_v16 }
 0x2c7   :  { %v1778_v27 = vmul.u32.u64.low %v1745_v18, %v896_v11  ;;  %v1779_v30 = vmul.u32.u64.high %v1745_v18, %v896_v11, %v1778_v27  ;;  %v1782_v10 = vmul.u32.u64.low %v1745_v18, %v892_v58  ;;  %v1783_v56 = vmul.u32.u64.high %v1745_v18, %v892_v58, %v1782_v10 }
 0x2c8   :  { %v659_v15 = vshrl.u32 %v1349_v39, %v656_v16  ;;  %v661_v57 = vshll.u32 %v1349_v39, %v655_v49  ;;  %v662_v6 = vshrl.u32 %v1350_v41, %v656_v16  ;;  %v664_v44 = vshll.u32 %v1350_v41, %v655_v49 }
 0x2c9   :  { %v665_v32 = vshrl.u32 %v1351_v43, %v656_v16  ;;  %v667_v5 = vshll.u32 %v1351_v43, %v655_v49  ;;  %v668_v33 = vshrl.u32 %v1352_v45, %v656_v16  ;;  %v670_v18 = vshll.u32 %v1352_v45, %v655_v49 }
 0x2ca   :  { %v660_v2 = vor.u32 %v659_v15, %v658_v24  ;;  %v663_v14 = vor.u32 %v662_v6, %v661_v57  ;;  %v671_v19 = vshrl.u32 %v1353_v52, %v656_v16  ;;  %vm906_vm14 = vc.u32 %v1779_v30, %v1782_v10 }
 0x2cb   :  { %v907_v29 = vadd.s32 1, %v1783_v56  ;;  %v666_v34 = vor.u32 %v665_v32, %v664_v44  ;;  %vm673_vm15 = vcmp.lt.s32.totalorder %v654_v22, 1  ;;  %v669_v51 = vor.u32 %v668_v33, %v667_v5 }
 0x2cc   :  { %v672_v46 = vor.u32 %v671_v19, %v670_v18  ;;  %vm674_vm1 = vcmp.lt.s32.totalorder %v654_v22, 2  ;;  %vm675_vm2 = vcmp.lt.s32.totalorder %v654_v22, 3  ;;  %vm676_vm3 = vcmp.lt.s32.totalorder %v654_v22, 4 }
 0x2cd   :  { %v908_v47 = vsel %vm906_vm14, %v907_v29, %v1783_v56  ;;  %v677_v48 = vsel %vm673_vm15, %v657_v21, %v660_v2  ;;  %v681_v26 = vsel %vm673_vm15, %v660_v2, %v663_v14  ;;  %v678_v53 = vsel %vm676_vm3, %v666_v34, 2102212464 }
 0x2ce   :  { %v909_v38 = vadd.s32 %v908_v47, %v904_v25  ;;  %v682_v49 = vsel %vm676_vm3, %v669_v51, 920167782  ;;  %v685_v13 = vsel %vm673_vm15, %v663_v14, %v666_v34  ;;  %v679_v62 = vsel %vm675_vm2, %v663_v14, %v678_v53 }
 0x2cf   :  { %v683_v8 = vsel %vm675_vm2, %v666_v34, %v682_v49  ;;  %v686_v63 = vsel %vm676_vm3, %v672_v46, 1326507024  ;;  %v749_v7 = vshrl.u32 %v748_v40, 23  ;;  %v680_v12 = vsel %vm674_vm1, %v677_v48, %v679_v62 }
 0x2d0   :  { %v910_v1 = vadd.s32 536870912, %v909_v38  ;;  %v684_v0 = vsel %vm674_vm1, %v681_v26, %v683_v8  ;;  %v687_v16 = vsel %vm675_vm2, %v669_v51, %v686_v63  ;;  %v965_v56 = vsel %vm964_vm4, %v1754_v28, 0 }
 0x2d1   :  { %v688_v20 = vsel %vm674_vm1, %v685_v13, %v687_v16  ;;  %v1805_v58 = vmul.u32.u64.low %v1748_v36, %v684_v0  ;;  %v1806_v11 = vmul.u32.u64.high %v1748_v36, %v684_v0, %v1805_v58  ;;  %v967_v21 = vand.u32 31, %v965_v56 }
 0x2d2   :  { %v1809_v25 = vshrl.u32 %v910_v1, 30  ;;  %v1812_v24 = vmul.u32.u64.low %v1748_v36, %v688_v20  ;;  %v1813_v27 = vmul.u32.u64.high %v1748_v36, %v688_v20, %v1812_v24  ;;  %v1818_v40 = vshll.u32 %v961_v61, 8 }
 0x2d3   :  { %v1821_v22 = vadd.s32 %v1782_v10, %v1779_v30  ;;  %v696_v57 = vmul.u32 %v1748_v36, %v680_v12  ;;  %v1827_v6 = vand.u32 8388607, %v745_v35  ;;  %v699_v44 = vadd.s32 1, %v1806_v11 }
 0x2d4   :  { %v912_v15 = vshll.u32 %v1809_v25, 30  ;;  %v966_v32 = vshrl.u32 %v965_v56, 5  ;;  %v968_v28 = vsub.s32 32, %v967_v21  ;;  %v1203_v5 = vadd.s32 4294967169, %v749_v7 }
 0x2d5   :  { %v935_v23 = vsub.s32 4, %v1809_v25  ;;  %vm698_vm5 = vc.u32 %v1813_v27, %v1805_v58  ;;  %v970_v61 = vshll.u32 %v1348_v37, %v967_v21  ;;  %v973_v10 = vshll.u32 %v1349_v39, %v967_v21 }
 0x2d6   :  { %v1830_v33 = vsub.s32 %v909_v38, %v912_v15  ;;  %v700_v36 = vsel %vm698_vm5, %v699_v44, %v1806_v11  ;;  %v971_v30 = vshrl.u32 %v1349_v39, %v968_v28  ;;  %v974_v2 = vshrl.u32 %v1350_v41, %v968_v28 }
 0x2d7   :  { %v701_v18 = vadd.s32 %v700_v36, %v696_v57  ;;  %v976_v19 = vshll.u32 %v1350_v41, %v967_v21  ;;  %v977_v29 = vshrl.u32 %v1351_v43, %v968_v28  ;;  %v979_v46 = vshll.u32 %v1351_v43, %v967_v21 }
 0x2d8   :  { %v915_v14 = vsub.s32 0, %v1830_v33  ;;  %v972_v34 = vor.u32 %v971_v30, %v970_v61  ;;  %v975_v51 = vor.u32 %v974_v2, %v973_v10  ;;  %v980_v47 = vshrl.u32 %v1352_v45, %v968_v28 }
 0x2d9   :  { %v702_v26 = vadd.s32 536870912, %v701_v18  ;;  %v969_v38 = vshrl.u32 %v1348_v37, %v968_v28  ;;  %v978_v53 = vor.u32 %v977_v29, %v976_v19  ;;  %v982_v13 = vshll.u32 %v1352_v45, %v967_v21 }
 0x2da   :  { %v1208_v48 = vmin.u32 %v915_v14, %v1830_v33  ;;  %v981_v49 = vor.u32 %v980_v47, %v979_v46  ;;  %v983_v62 = vshrl.u32 %v1353_v52, %v968_v28  ;;  %vm985_vm6 = vcmp.lt.s32.totalorder %v966_v32, 1 }
 0x2db   :  { %v1850_v63 = vshrl.u32 %v702_v26, 30  ;;  %vm986_vm8 = vcmp.lt.s32.totalorder %v966_v32, 2  ;;  %vm988_vm9 = vcmp.lt.s32.totalorder %v966_v32, 4  ;;  %vm987_vm10 = vcmp.lt.s32.totalorder %v966_v32, 3 }
 0x2dc   :  { %v917_v8 = vclz %v1208_v48  ;;  %v984_v1 = vor.u32 %v983_v62, %v982_v13  ;;  %v990_v0 = vsel %vm988_vm9, %v978_v53, 2102212464  ;;  %v993_v16 = vsel %vm985_vm6, %v972_v34, %v975_v51 }
 0x2dd   :  { %v704_v12 = vshll.u32 %v1850_v63, 30  ;;  %v989_v20 = vsel %vm985_vm6, %v969_v38, %v972_v34  ;;  %v994_v11 = vsel %vm988_vm9, %v981_v49, 920167782  ;;  %v991_v24 = vsel %vm987_vm10, %v975_v51, %v990_v0 }
 0x2de   :  { %v1209_v7 = vadd.s32 4294967294, %v917_v8  ;;  %v995_v56 = vsel %vm987_vm10, %v978_v53, %v994_v11  ;;  %v997_v21 = vsel %vm985_vm6, %v975_v51, %v978_v53  ;;  %v998_v15 = vsel %vm988_vm9, %v984_v1, 1326507024 }
 0x2df   :  { %v1856_v57 = vsub.s32 %v701_v18, %v704_v12  ;;  %v996_v44 = vsel %vm986_vm8, %v993_v16, %v995_v56  ;;  %v999_v28 = vsel %vm987_vm10, %v981_v49, %v998_v15  ;;  %v753_v29 = vor.u32 8388608, %v1827_v6 }
 0x2e0   :  { %vm1210_vm11 = vcmp.lt.s32.totalorder %v1209_v7, 0  ;;  %v1000_v36 = vsel %vm986_vm8, %v997_v21, %v999_v28  ;;  %v1861_v30 = vmul.u32.u64.low %v1818_v40, %v996_v44  ;;  %v1862_v10 = vmul.u32.u64.high %v1818_v40, %v996_v44, %v1861_v30 }
 0x2e1   :  { %v920_v61 = vsel %vm1210_vm11, 0, %v1209_v7  ;;  %v707_v19 = vsub.s32 0, %v1856_v57  ;;  %v992_v18 = vsel %vm986_vm8, %v989_v20, %v991_v24  ;;  %v755_v46 = vadd.s32 1, %v1203_v5 }
 0x2e2   :  { %v921_v2 = vsub.s32 32, %v920_v61  ;;  %v925_v14 = vsub.s32 4294967266, %v920_v61  ;;  %v1869_v34 = vmul.u32.u64.low %v1818_v40, %v1000_v36  ;;  %v1870_v51 = vmul.u32.u64.high %v1818_v40, %v1000_v36, %v1869_v34 }
 0x2e3   :  { %v922_v47 = vshll.u32 %v1830_v33, %v920_v61  ;;  %v1200_v38 = vmin.u32 %v707_v19, %v1856_v57  ;;  %vm1877_vm12 = vcmp.le.f32.partialorder %v849_v4, 0.7853982  ;;  %v1884_v6 = vsel %vm851_vm7, %v935_v23, %v1809_v25 }
 0x2e4   :  { %v923_v48 = vshrl.u32 %v1821_v22, %v921_v2  ;;  %v926_v26 = vadd.s32 127, %v925_v14  ;;  %v1011_v32 = vadd.s32 1, %v1862_v10  ;;  %vm756_vm13 = vcmp.gt.s32.totalorder %v755_v46, 0 }
 0x2e5   :  { %v709_v22 = vclz %v1200_v38  ;;  %v757_v49 = vsel %vm756_vm13, %v755_v46, 0  ;;  %v697_v13 = vadd.s32 %v1805_v58, %v1813_v27  ;;  %v1008_v4 = vmul.u32 %v1818_v40, %v992_v18 }
 0x2e6   :  { %v924_v5 = vor.u32 %v923_v48, %v922_v47  ;;  %v927_v33 = vshll.u32 %v926_v26, 23  ;;  %vm1010_vm14 = vc.u32 %v1870_v51, %v1861_v30  ;;  %v759_v62 = vand.u32 31, %v757_v49 }
 0x2e7   :  { %v1201_v1 = vadd.s32 4294967294, %v709_v22  ;;  %v1012_v25 = vsel %vm1010_vm14, %v1011_v32, %v1862_v10  ;;  %v1893_v23 = vshll.u32 %v753_v29, 8  ;;  %v727_v7 = vsub.s32 4, %v1850_v63 }
 0x2e8   :  { %v928_v8 = vor.u32 4788187, %v927_v33  ;;  %v1013_v0 = vadd.s32 %v1012_v25, %v1008_v4  ;;  %v760_v16 = vsub.s32 32, %v759_v62  ;;  %v938_v58 = vsel %vm1877_vm12, 0, %v1884_v6 }
 0x2e9   :  { %v931_v40 = vcvt.s32.f32 %v924_v5  ;;  %vm1202_vm15 = vcmp.lt.s32.totalorder %v1201_v1, 0  ;;  %v1899_v12 = vshrl.u32 %v757_v49, 5  ;;  %v762_v24 = vshll.u32 %v1348_v37, %v759_v62 }
 0x2ea   :  { %v929_v27 = vand.u32 2147483647, %v928_v8  ;;  %v712_v20 = vsel %vm1202_vm15, 0, %v1201_v1  ;;  %v1014_v11 = vadd.s32 536870912, %v1013_v0  ;;  %v763_v56 = vshrl.u32 %v1349_v39, %v760_v16 }
 0x2eb   :  { %v713_v15 = vsub.s32 32, %v712_v20  ;;  %v717_v44 = vsub.s32 4294967266, %v712_v20  ;;  %v765_v28 = vshll.u32 %v1349_v39, %v759_v62  ;;  %v714_v61 = vshll.u32 %v1856_v57, %v712_v20 }
 0x2ec   :  { %v932_v21 = vmul.f32 %v931_v40, %v929_v27  ;;  %v1905_v36 = vshrl.u32 %v1014_v11, 30  ;;  %v766_v10 = vshrl.u32 %v1350_v41, %v760_v16  ;;  %v769_v2 = vshrl.u32 %v1351_v43, %v760_v16 }
 0x2ed   :  { %v715_v19 = vshrl.u32 %v697_v13, %v713_v15  ;;  %v718_v29 = vadd.s32 127, %v717_v44  ;;  %v772_v18 = vshrl.u32 %v1352_v45, %v760_v16  ;;  %v764_v46 = vor.u32 %v763_v56, %v762_v24 }
 0x2ee   :  { %v933_v14 = vxor.u32 2147483648, %v932_v21  ;;  %v1016_v34 = vshll.u32 %v1905_v36, 30  ;;  %v768_v47 = vshll.u32 %v1350_v41, %v759_v62  ;;  %v771_v39 = vshll.u32 %v1351_v43, %v759_v62 }
 0x2ef   :  { %v716_v48 = vor.u32 %v715_v19, %v714_v61  ;;  %v719_v26 = vshll.u32 %v718_v29, 23  ;;  %v767_v38 = vor.u32 %v766_v10, %v765_v28  ;;  %vm643_vm1 = vcmp.lt.s32.totalorder %v1727_v55, 0 }
 0x2f0   :  { %v934_v57 = vsel %vm851_vm7, %v933_v14, %v932_v21  ;;  %v1919_v5 = vsub.s32 %v1013_v0, %v1016_v34  ;;  %v770_v33 = vor.u32 %v769_v2, %v768_v47  ;;  %v773_v22 = vor.u32 %v772_v18, %v771_v39 }
 0x2f1   :  { %v937_v32 = vsel %vm1877_vm12, %v1723_v3, %v934_v57  ;;  %v720_v41 = vor.u32 4788187, %v719_v26  ;;  %v774_v43 = vshll.u32 %v1352_v45, %v759_v62  ;;  %v775_v49 = vshrl.u32 %v1353_v52, %v760_v16 }
 0x2f2   :  { %1317 = vcosq.f32 %v937_v32  ;;  %v723_v13 = vcvt.s32.f32 %v716_v48  ;;  %v1019_v4 = vsub.s32 0, %v1919_v5  ;;  %v761_v8 = vshrl.u32 %v1348_v37, %v760_v16 }
 0x2f3   :  { %1319 = vsinq.f32 %v937_v32  ;;  %v721_v1 = vand.u32 2147483647, %v720_v41  ;;  %v776_v25 = vor.u32 %v775_v49, %v774_v43  ;;  %vm777_vm2 = vcmp.lt.s32.totalorder %v1899_v12, 1 }
 0x2f4   :  { %vm780_vm3 = vcmp.lt.s32.totalorder %v1899_v12, 4  ;;  %v1212_v0 = vmin.u32 %v1019_v4, %v1919_v5  ;;  %vm778_vm4 = vcmp.lt.s32.totalorder %v1899_v12, 2  ;;  %v785_v45 = vsel %vm777_vm2, %v764_v46, %v767_v38 }
 0x2f5   :  { %v782_v27 = vsel %vm780_vm3, %v770_v33, 2102212464  ;;  %v724_v62 = vmul.f32 %v723_v13, %v721_v1  ;;  %vm779_vm5 = vcmp.lt.s32.totalorder %v1899_v12, 3  ;;  %v786_v52 = vsel %vm780_vm3, %v773_v22, 920167782 }
 0x2f6   :  { %v789_v40 = vsel %vm777_vm2, %v767_v38, %v770_v33  ;;  %v1021_v20 = vclz %v1212_v0  ;;  %v781_v11 = vsel %vm777_vm2, %v761_v8, %v764_v46  ;;  %v787_v37 = vsel %vm779_vm5, %v770_v33, %v786_v52 }
 0x2f7   :  { %v790_v16 = vsel %vm780_vm3, %v776_v25, 1326507024  ;;  %v725_v24 = vxor.u32 2147483648, %v724_v62  ;;  %v783_v56 = vsel %vm779_vm5, %v767_v38, %v782_v27  ;;  %v788_v21 = vsel %vm778_vm4, %v785_v45, %v787_v37 }
 0x2f8   :  { %v791_v15 = vsel %vm779_vm5, %v773_v22, %v790_v16  ;;  %v1213_v44 = vadd.s32 4294967294, %v1021_v20  ;;  %v1935_v61 = vmul.u32.u64.low %v1893_v23, %v788_v21  ;;  %v1936_v10 = vmul.u32.u64.high %v1893_v23, %v788_v21, %v1935_v61 }
 0x2f9   :  { %v792_v28 = vsel %vm778_vm4, %v789_v40, %v791_v15  ;;  %vm1941_vm6 = vcmp.le.f32.partialorder %v641_v17, 0.7853982  ;;  %v726_v14 = vsel %vm643_vm1, %v725_v24, %v724_v62  ;;  %v942_v17 = vadd.s32 3, %v938_v58 }
 0x2fa   :  { %v1948_v19 = vmul.u32.u64.low %v1893_v23, %v792_v28  ;;  %v1949_v29 = vmul.u32.u64.high %v1893_v23, %v792_v28, %v1948_v19  ;;  %v729_v18 = vsel %vm1941_vm6, %v1727_v55, %v726_v14  ;;  %vm1214_vm7 = vcmp.lt.s32.totalorder %v1213_v44, 0 }
 0x2fb   :  { %1321 = vcosq.f32 %v729_v18  ;;  %v784_v34 = vsel %vm778_vm4, %v781_v11, %v783_v56  ;;  %v728_v46 = vsel %vm643_vm1, %v727_v7, %v1850_v63  ;;  %v1024_v47 = vsel %vm1214_vm7, 0, %v1213_v44 }
 0x2fc   :  { %1323 = vsinq.f32 %v729_v18  ;;  %vm802_vm8 = vc.u32 %v1949_v29, %v1935_v61  ;;  %v803_v53 = vadd.s32 1, %v1936_v10  ;;  %v800_v6 = vmul.u32 %v1893_v23, %v784_v34  ;;  %v1299_v23 = vld [vmem:[%s2044_s4 + $0x8] sm:$0xff]  }
 0x2fd   :  { %v1969_v58 = vstv %s1174_s3  ;;  %v943_v12 = vand.u32 3, %v942_v17  ;;  %v730_v26 = vsel %vm1941_vm6, 0, %v728_v46  ;;  %v1029_v38 = vsub.s32 4294967266, %v1024_v47 }
 0x2fe   :  { %v804_v48 = vsel %vm802_vm8, %v803_v53, %v1936_v10  ;;  %v1060_v33 = vmul.f32 %v1969_v58, %v1645_v50  ;;  %v734_v41 = vadd.s32 3, %v730_v26  ;;  %vm941_vm12 = vweird.f32 %v1723_v3 }
 0x2ff   :  { %v1318_v39 = vpop.eup %1317  ;;  %v805_v63 = vadd.s32 %v804_v48, %v800_v6  ;;  %vm945_vm9 = vcmp.eq.s32.totalorder %v943_v12, 0  ;;  %vm948_vm10 = vcmp.eq.s32.totalorder %v943_v12, 2  ;;  %vm944_vm11 = vcmp.lt.s32.totalorder %v943_v12, 2 }
 0x300   :  { %v1320_v57 = vpop.eup %1319  ;;  %v949_v32 = vxor.u32 2147483648, %v1318_v39  ;;  %v1030_v13 = vadd.s32 127, %v1029_v38  ;;  %v1354_v1 = vmov 0.0   ;;  %v1025_v25 = vsub.s32 32, %v1024_v47 }
 0x301   :  { %v946_v7 = vxor.u32 2147483648, %v1320_v57  ;;  %v806_v22 = vadd.s32 536870912, %v805_v63  ;;  %1246 = vmatprep.subr.bf16.mxu0 %v1354_v1  ;;  %v735_v27 = vand.u32 3, %v734_v41  ;;  %v1009_v52 = vadd.s32 %v1861_v30, %v1870_v51 }
 0x302   :  { %v950_v49 = vsel %vm948_vm10, %v949_v32, %v1320_v57  ;;  %1247 = vmatpush3.bf16.msra.mxu0 %v1299_v23  ;;  %v1031_v40 = vshll.u32 %v1030_v13, 23  ;;  %v1026_v56 = vshll.u32 %v1919_v5, %v1024_v47  ;;  %vm733_vm1 = vweird.f32 %v1727_v55 }
 0x303   :  { %v947_v43 = vsel %vm945_vm9, %v1318_v39, %v946_v7  ;;  %v1979_v4 = vshrl.u32 %v806_v22, 30  ;;  %1248 = vmatprep.subr.bf16.mxu0 %v1354_v1  ;;  %v1027_v37 = vshrl.u32 %v1009_v52, %v1025_v25  ;;  %vm740_vm13 = vcmp.eq.s32.totalorder %v735_v27, 2 }
 0x304   :  { %v951_v8 = vsel %vm944_vm11, %v947_v43, %v950_v49  ;;  %vm737_vm14 = vcmp.eq.s32.totalorder %v735_v27, 0  ;;  %v1032_v15 = vor.u32 4788187, %v1031_v40  ;;  %vm736_vm15 = vcmp.lt.s32.totalorder %v735_v27, 2 }
 0x305   :  { %v952_v50 = vsel %vm941_vm12, nan, %v951_v8  ;;  %v808_v0 = vshll.u32 %v1979_v4, 30  ;;  %v1058_v30 = vmul.f32 %v1969_v58, %v1713_v54  ;;  %v1028_v51 = vor.u32 %v1027_v37, %v1026_v56 }
 0x306   :  { %v1984_v45 = vadd.f32 %v1060_v33, %v952_v50  ;;  %v1033_v18 = vand.u32 2147483647, %v1032_v15  ;;  %v801_v47 = vadd.s32 %v1935_v61, %v1949_v29  ;;  %vm955_vm3 = vcmp.lt.s32.totalorder %v1733_v9, 0 }
 0x307   :  { %v809_v3 = vsub.s32 %v805_v63, %v808_v0  ;;  %v1035_v5 = vcvt.s32.f32 %v1028_v51  ;;  %vm2000_vm4 = vcmp.le.f32.partialorder %v953_v42, 0.7853982  ;;  %vm747_vm5 = vcmp.lt.s32.totalorder %v1743_v59, 0 }
 0x308   :  { %v1322_v62 = vpop.eup %1321  ;;  %v831_v23 = vsub.s32 4, %v1979_v4  ;;  %vm746_vm6 = vcmp.le.f32.partialorder %v745_v35, 0.7853982  ;;  %v1039_v41 = vsub.s32 4, %v1905_v36  ;;  %vm837_vm10 = vweird.f32 %v1743_v59 }
 0x309   :  { %v1324_v20 = vpop.eup %1323  ;;  %v741_v11 = vxor.u32 2147483648, %v1322_v62  ;;  %v811_v16 = vsub.s32 0, %v809_v3  ;;  %v1036_v46 = vmul.f32 %v1035_v5, %v1033_v18 }
 0x30a   :  { %v738_v24 = vxor.u32 2147483648, %v1324_v20  ;;  %v832_v43 = vsel %vm747_vm5, %v831_v23, %v1979_v4  ;;  %v1040_v49 = vsel %vm955_vm3, %v1039_v41, %v1905_v36  ;;  %v1300_v4 = vld [vmem:[%s2044_s4] sm:$0xff]  }
 0x30b   :  { %v742_v21 = vsel %vm740_vm13, %v741_v11, %v1324_v20  ;;  %v1204_v44 = vmin.u32 %v811_v16, %v809_v3  ;;  %v1037_v54 = vxor.u32 2147483648, %v1036_v46  ;;  %v834_v13 = vsel %vm746_vm6, 0, %v832_v43  ;;  %1249 = vmatpush3.bf16.msra.mxu0 %v1300_v4 }
 0x30c   :  { %v739_v28 = vsel %vm737_vm14, %v1322_v62, %v738_v24  ;;  %v838_v8 = vadd.s32 3, %v834_v13  ;;  %v1042_v50 = vsel %vm2000_vm4, 0, %v1040_v49  ;;  %v1059_v24 = vmul.f32 %v1969_v58, %v1715_v60 }
 0x30d   :  { %v743_v10 = vsel %vm736_vm15, %v739_v28, %v742_v21  ;;  %v813_v2 = vclz %v1204_v44  ;;  %v1038_v38 = vsel %vm955_vm3, %v1037_v54, %v1036_v46  ;;  %v1046_v35 = vadd.s32 3, %v1042_v50 }
 0x30e   :  { %v744_v14 = vsel %vm733_vm1, nan, %v743_v10  ;;  %v1041_v32 = vsel %vm2000_vm4, %v1733_v9, %v1038_v38  ;;  %v839_v0 = vand.u32 3, %v838_v8  ;;  %vm1355_vm13 = vmmov 0  }
 0x30f   :  { %v1062_v19 = vadd.f32 %v1058_v30, %v744_v14  ;;  %v1205_v17 = vadd.s32 4294967294, %v813_v2  ;;  %1325 = vcosq.f32 %v1041_v32  ;;  %1250 = vmatprep.mubr.msk.bf16.mxu0 %vm1355_vm13, %v1354_v1  ;;  %vm1045_vm15 = vweird.f32 %v1733_v9  ;;  %v1215_v1 = vld [vmem:[%s2045_s5] ss:$0 sm:$0xff] }
 0x310   :  { %1327 = vsinq.f32 %v1041_v32  ;;  %vm844_vm7 = vcmp.eq.s32.totalorder %v839_v0, 2  ;;  %vm841_vm8 = vcmp.eq.s32.totalorder %v839_v0, 0  ;;  %vm840_vm9 = vcmp.lt.s32.totalorder %v839_v0, 2 }
 0x311   :  { %1066 = vxpose.xlu1.b32.start [1/4] (short) (narrow) %v1062_v19, 16  ;;  %vm1206_vm2 = vcmp.lt.s32.totalorder %v1205_v17, 0  ;;  %v1061_v60 = vmul.f32 %v1969_v58, %v1695_v31  ;;  %vm1166_vm1 = vcmask 31744  }
 0x312   :  { %v816_v34 = vsel %vm1206_vm2, 0, %v1205_v17 }
 0x313   :  { %v817_v53 = vsub.s32 32, %v816_v34  ;;  %v821_v55 = vsub.s32 4294967266, %v816_v34  ;;  %v818_v39 = vshll.u32 %v809_v3, %v816_v34  ;;  %v1047_v3 = vand.u32 3, %v1046_v35 }
 0x315   :  { %v819_v6 = vshrl.u32 %v801_v47, %v817_v53  ;;  %v822_v12 = vadd.s32 127, %v821_v55  ;;  %vm1049_vm11 = vcmp.eq.s32.totalorder %v1047_v3, 0  ;;  %vm1052_vm12 = vcmp.eq.s32.totalorder %v1047_v3, 2 }
 0x316   :  { %vm1048_vm14 = vcmp.lt.s32.totalorder %v1047_v3, 2 }
 0x317   :  { %v820_v57 = vor.u32 %v819_v6, %v818_v39  ;;  %v823_v48 = vshll.u32 %v822_v12, 23 }
 0x319   :  { %v824_v26 = vor.u32 4788187, %v823_v48  ;;  %v827_v7 = vcvt.s32.f32 %v820_v57 }
 0x31b   :  { %v825_v63 = vand.u32 2147483647, %v824_v26 }
 0x31c   :  { %v1326_v25 = vpop.eup %1325 }
 0x31d   :  { %v828_v29 = vmul.f32 %v827_v7, %v825_v63  ;;  %v1328_v27 = vpop.eup %1327  ;;  %v1053_v11 = vxor.u32 2147483648, %v1326_v25 }
 0x31e   :  { %v1050_v36 = vxor.u32 2147483648, %v1328_v27 }
 0x31f   :  { %v829_v33 = vxor.u32 2147483648, %v828_v29  ;;  %v1054_v44 = vsel %vm1052_vm12, %v1053_v11, %v1328_v27 }
 0x320   :  { %v1051_v15 = vsel %vm1049_vm11, %v1326_v25, %v1050_v36 }
 0x321   :  { %v830_v22 = vsel %vm747_vm5, %v829_v33, %v828_v29  ;;  %v1055_v10 = vsel %vm1048_vm14, %v1051_v15, %v1054_v44 }
 0x322   :  { %v833_v42 = vsel %vm746_vm6, %v1743_v59, %v830_v22  ;;  %v1056_v30 = vsel %vm1045_vm15, nan, %v1055_v10 }
 0x323   :  { %1329 = vcosq.f32 %v833_v42  ;;  %v1065_v59 = vadd.f32 %v1061_v60, %v1056_v30 }
 0x324   :  { %1331 = vsinq.f32 %v833_v42 }
 0x330   :  { %v1330_v62 = vpop.eup %1329 }
 0x331   :  { %v1332_v52 = vpop.eup %1331  ;;  %v845_v40 = vxor.u32 2147483648, %v1330_v62 }
 0x332   :  { %v842_v20 = vxor.u32 2147483648, %v1332_v52 }
 0x333   :  { %v846_v37 = vsel %vm844_vm7, %v845_v40, %v1332_v52 }
 0x334   :  { %v843_v16 = vsel %vm841_vm8, %v1330_v62, %v842_v20 }
 0x335   :  { %v847_v56 = vsel %vm840_vm9, %v843_v16, %v846_v37 }
 0x336   :  { %v848_v21 = vsel %vm837_vm10, nan, %v847_v56 }
 0x337   :  { %v1063_v28 = vadd.f32 %v1059_v24, %v848_v21 }
 0x339   :  { %1067 = vxpose.xlu1.b32.cont [2/4] (short) (narrow) %v1063_v28, 16 }
 0x33d   :  { %1068 = vxpose.xlu1.b32.cont [3/4] (short) (narrow) %v1984_v45, 16 }
 0x341   :  { %1069 = vxpose.xlu1.b32.end [4/4] (short) (narrow) %v1065_v59, 16 }
 0x3b1   :  { %v1082_v51 = vpop.trf.xlu1 }
 0x3b5   :  { %v1083_v2 = vpop.trf.xlu1 }
 0x3b6   :  { %v1098_v14 = vpack.c.bf16 %v1083_v2, %v1082_v51 }
 0x3b8   :  { %1251 = vmatmul.mubr.msk.bf16.vlgmr.msra.gmra.mxu0 %vm89_vm0, %v1098_v14 }
 0x478   :  { %v1159_v19 = vpop.f32.mrf.mxu0 }
 0x479   :  { %v1160_v9 = vadd.f32 %v1215_v1, %v1159_v19 }
 0x47a   :  { %v1252_v18 = vpop.f32.mrf.mxu0 }
 0x47b   :  { %1167 = vst.msk [vmem:[%s2046_s6] sm:$0xff] %vm1166_vm1, %v1160_v9 }
 0x47c   :  { %v1162_v31 = vpop.f32.mrf.mxu0 }
 0x47d   :  { %v1163_v58 = vadd.f32 %v1215_v1, %v1162_v31 }
 0x47e   :  { %v1253_v45 = vpop.f32.mrf.mxu0 }
 0x47f   :  { %1168 = vst.msk [vmem:[%s2046_s6 + $0x8] sm:$0xff] %vm1166_vm1, %v1163_v58 }
 0x480   :  { %1173 = vsyncpa [#allocation3], 1 }

</bundles_post_ra>
